<compile_context>
chip_gen: v7x
topology: tpu7x:2x2x1
jax: 0.10.0
libtpu: 0.0.40
codegen_flags: <defaults>
</compile_context>

<pallas_src>
import math

import jax
import jax.numpy as jnp
from jax.experimental import pallas as pl
from jax.experimental.pallas import tpu as pltpu


def _pe_add_kernel(x_ref, pe_ref, o_ref):
    # x_ref / o_ref : (TB, TL, TC) block covering TB batch elements (lane-dense last dim).
    # pe_ref        : (TL, TC)     matching positional-encoding tile (same layout).
    # Broadcast over the leading TB axis is free; the add is a pure VPU op.
    o_ref[...] = x_ref[...] + pe_ref[...][None, :, :]


def _choose_lane_tile(chw_pad: int, tl: int, itemsize: int, max_block_bytes: int) -> int:
    """Largest multiple-of-128 divisor of chw_pad with tl*tc*itemsize <= cap."""
    n128 = chw_pad // 128
    for k in range(n128, 0, -1):
        tc = 128 * k
        if chw_pad % tc == 0 and tl * tc * itemsize <= max_block_bytes:
            return tc
    return 128  # tl <= 32, so a single 128-lane tile always fits the cap


def _choose_batch_tile(B: int, tl: int, tc: int, itemsize: int, max_block_bytes: int) -> int:
    """Largest divisor of B with tb*tl*tc*itemsize <= cap (at least 1)."""
    for tb in range(B, 0, -1):
        if B % tb == 0 and tb * tl * tc * itemsize <= max_block_bytes:
            return tb
    return 1


def make_positional_encoding(d_model: int, dropout: float = 0.0, max_len: int = 32,
                             max_block_bytes: int = 2 << 20):
    """Builds the pe table (matches the PyTorch __init__) and returns a Pallas forward."""
    assert d_model % 2 == 0, "d_model must be even (sin/cos interleave)"

    position = jnp.arange(max_len, dtype=jnp.float32)[:, None]            # (max_len, 1)
    div_term = jnp.exp(
        jnp.arange(0, d_model, 2, dtype=jnp.float32) * (-math.log(10000.0) / d_model)
    )                                                                      # (d_model/2,)
    pe = jnp.zeros((max_len, d_model), dtype=jnp.float32)
    pe = pe.at[:, 0::2].set(jnp.sin(position * div_term))
    pe = pe.at[:, 1::2].set(jnp.cos(position * div_term))
    # Conceptually pe is (1, max_len, d_model, 1, 1); broadcasting handled via wrapper reshape.

    pe_flat_cache = {}

    def _pe_flat(L: int, hw: int, chw_pad: int, dtype):
        """Cached (L, chw_pad) broadcast of pe in the activation dtype."""
        key = (L, hw, chw_pad, jnp.dtype(dtype).name)
        if key not in pe_flat_cache:
            chw = d_model * hw
            # NOTE: add happens in x.dtype (PyTorch would promote to f32 if x were bf16;
            # exact match for the f32 case used here).
            pf = jnp.broadcast_to(pe[:L, :, None].astype(dtype), (L, d_model, hw)).reshape(L, chw)
            if chw_pad != chw:
                pf = jnp.pad(pf, ((0, 0), (0, chw_pad - chw)))
            pe_flat_cache[key] = jax.block_until_ready(pf)
        return pe_flat_cache[key]

    def forward(x):
        # x: (B, L, C, H, W), L <= max_len, C == d_model. Kept in its native dtype.
        B, L, C, H, W = x.shape
        assert C == d_model and L <= max_len
        hw = H * W
        chw = C * hw
        chw_pad = ((chw + 127) // 128) * 128  # lane-dense, unmasked stores on all chips

        x_flat = x.reshape(B, L, chw)
        if chw_pad != chw:
            x_flat = jnp.pad(x_flat, ((0, 0), (0, 0), (0, chw_pad - chw)))
        pe_flat = _pe_flat(L, hw, chw_pad, x.dtype)

        itemsize = jnp.dtype(x.dtype).itemsize
        tl = L  # full L per block (max_len defaults to 32 -> tiny in sublanes)
        tc = _choose_lane_tile(chw_pad, tl, itemsize, max_block_bytes)
        tb = _choose_batch_tile(B, tl, tc, itemsize, max_block_bytes)
        n_t = chw_pad // tc
        nb = B // tb

        out = pl.pallas_call(
            _pe_add_kernel,
            out_shape=jax.ShapeDtypeStruct((B, L, chw_pad), x.dtype),
            # Batch axis innermost: pe's block index is constant across consecutive steps,
            # so its tile stays resident in VMEM instead of being re-DMA'd every iteration.
            grid=(n_t, nb),
            in_specs=[
                pl.BlockSpec((tb, tl, tc), lambda t, b: (b, 0, t)),
                pl.BlockSpec((tl, tc), lambda t, b: (0, t)),
            ],
            out_specs=pl.BlockSpec((tb, tl, tc), lambda t, b: (b, 0, t)),
            compiler_params=pltpu.CompilerParams(
                dimension_semantics=("parallel", "parallel"),
                vmem_limit_bytes=32 * 1024 * 1024,
            ),
        )(x_flat, pe_flat)

        if chw_pad != chw:
            out = out[..., :chw]
        # Dropout(p=0.0) is the identity.
        # TODO(synk): dropout with p>0 / training mode not implemented (module default p=0.0).
        return out.reshape(B, L, C, H, W)

    return forward, pe


if __name__ == "__main__":
    key = jax.random.PRNGKey(0)
    k1, k2 = jax.random.split(key)

    # Shapes consistent with the module: x is (B, L, d_model, H, W).
    B, L, d_model, max_len = 2, 8, 32, 32
    fwd, pe = make_positional_encoding(d_model=d_model, dropout=0.0, max_len=max_len)

    # Case 1: C*H*W = 512 (multiple of 128 -> unpadded lane-dense path).
    H, W = 4, 4
    x = jax.random.normal(k1, (B, L, d_model, H, W), dtype=jnp.float32)
    out = jax.block_until_ready(fwd(x))
    ref = x + pe[:L, :][None, :, :, None, None]
    assert out.shape == x.shape
    assert jnp.allclose(out, ref, atol=1e-6, rtol=1e-6), "mismatch vs reference (aligned case)"

    # Case 2: C*H*W = 288 (NOT a multiple of 128 -> exercises the lane-padding path).
    H2, W2 = 3, 3
    x2 = jax.random.normal(k2, (B, L, d_model, H2, W2), dtype=jnp.float32)
    out2 = jax.block_until_ready(fwd(x2))
    ref2 = x2 + pe[:L, :][None, :, :, None, None]
    assert out2.shape == x2.shape
    assert jnp.allclose(out2, ref2, atol=1e-6, rtol=1e-6), "mismatch vs reference (padded case)"

    print("KERNEL_OK")
</pallas_src>

<mosaic_0001>
module attributes {stable_mosaic.version = 11 : i64} {
  func.func @_pe_add_kernel(%arg0: i32, %arg1: i32, %arg2: memref<2x8x512xf32, #tpu.memory_space<vmem>>, %arg3: memref<8x512xf32, #tpu.memory_space<vmem>>, %arg4: memref<2x8x512xf32, #tpu.memory_space<vmem>>) attributes {dimension_semantics = [#tpu.dimension_semantics<parallel>, #tpu.dimension_semantics<parallel>], iteration_bounds = array<i64: 1, 1>, scalar_prefetch = 0 : i64, scratch_operands = 0 : i64, tpu.core_type = #tpu.core_type<tc>, window_params = [{transform_indices = @transform_0, window_bounds = array<i64: 2, 8, 512>}, {transform_indices = @transform_1, window_bounds = array<i64: 8, 512>}, {transform_indices = @transform_2, window_bounds = array<i64: 2, 8, 512>}]} {
    %c0 = arith.constant 0 : index
    %c0_0 = arith.constant 0 : index
    %c0_1 = arith.constant 0 : index
    %0 = vector.load %arg2[%c0, %c0_0, %c0_1] : memref<2x8x512xf32, #tpu.memory_space<vmem>>, vector<2x8x512xf32>
    %c0_2 = arith.constant 0 : index
    %c0_3 = arith.constant 0 : index
    %1 = vector.load %arg3[%c0_2, %c0_3] : memref<8x512xf32, #tpu.memory_space<vmem>>, vector<8x512xf32>
    %2 = vector.shape_cast %1 : vector<8x512xf32> to vector<1x8x512xf32>
    %3 = vector.broadcast %2 : vector<1x8x512xf32> to vector<2x8x512xf32>
    %4 = arith.addf %0, %3 : vector<2x8x512xf32>
    %c0_4 = arith.constant 0 : index
    %c0_5 = arith.constant 0 : index
    %c0_6 = arith.constant 0 : index
    %5 = vector.load %arg4[%c0_4, %c0_5, %c0_6] : memref<2x8x512xf32, #tpu.memory_space<vmem>>, vector<2x8x512xf32>
    tpu.vector_store %arg4[%c0_4, %c0_5, %c0_6], %4 {strides = array<i32>} : memref<2x8x512xf32, #tpu.memory_space<vmem>>, vector<2x8x512xf32>,
    return
  }
  func.func @transform_0(%arg0: i32, %arg1: i32) -> (i32, i32, i32) {
    %c0_i32 = arith.constant 0 : i32
    %c0_i32_0 = arith.constant 0 : i32
    return %arg1, %c0_i32, %arg0 : i32, i32, i32
  }
  func.func @transform_1(%arg0: i32, %arg1: i32) -> (i32, i32) {
    %c0_i32 = arith.constant 0 : i32
    %c0_i32_0 = arith.constant 0 : i32
    return %c0_i32, %arg0 : i32, i32
  }
  func.func @transform_2(%arg0: i32, %arg1: i32) -> (i32, i32, i32) {
    %c0_i32 = arith.constant 0 : i32
    %c0_i32_0 = arith.constant 0 : i32
    return %arg1, %c0_i32, %arg0 : i32, i32, i32
  }
}

</mosaic_0001>

<bundles_post_ra>
// kernel: tpu_custom_call.1
= control target key start
LH: loop header
LB: loop body
LE: loop exit
PB: predicated region body
PF: predicated region fallthrough
CT: control target
= control target key end

     0   :  { %7 = vsyncpa [#allocation3], 0  ;;  %s223_s0 = inlined_call_operand.hbm [shape: f32[2,8,512], index: 0, kind: input, shape index: {}]   ;;  %s224_s1 = inlined_call_operand.hbm [shape: f32[8,512], index: 1, kind: input, shape index: {}]   ;;  %s225_s2 = inlined_call_operand.hbm [shape: f32[2,8,512], index: 2, kind: output, shape index: {}]  }
   0x1   :  { %8 = vsyncpa [#allocation6], 0 }
   0x2   :  { %9 = vsyncpa [#allocation4], 0  ;;  %s161_s9 = smov [#allocation2]   ;;  %s89_s13 = scalar_lea.hbm %s223_s0, 1024 }
   0x3   :  { %s15_s10 = sshll.u32 %s161_s9, 4  ;;  %p90_p0 = scmp.ne.s32.totalorder %s223_s0, %s89_s13  ;;  %s16_s10 = int_to_ptr.vmem [resolvable:$true] %s15_s10 }
   0x4   :  { %p93_p1 = scmp.lt.u32.totalorder %s89_s13, %s223_s0 }
   0x6   :  { %p95_p2 = pnand %p93_p1, %p90_p0 }
   0x8   :  { %98 = shalt.err (!%p95_p2)
}
   0x9   :  { %s99_s18 = scalar_lea.vmem %s16_s10, 1024  ;;  %p104_p4 = scmp.lt.s32.totalorder %s16_s10, %s16_s10 }
   0xa   :  { %p100_p3 = scmp.ne.s32.totalorder %s16_s10, %s99_s18  ;;  %p105_p5 = scmp.lt.s32.totalorder %s99_s18, %s99_s18 }
   0xc   :  { %p106_p6 = por %p105_p5, %p104_p4 }
   0xe   :  { %p107_p7 = pnand %p106_p6, %p100_p3 }
  0x10   :  { %110 = shalt.err (!%p107_p7)
}
  0x11   :  { %s162_s19 = smov 512   ;;  %s163_s20 = smov 32  }
  0x12   :  { %21 = dma.hbm_to_vmem [thread:$0]  %s223_s0, 1024, %s16_s10, [#allocation3], %s162_s19, %s162_s19, %s163_s20  }
  0x13   :  { %s164_s23 = smov [#allocation5]   ;;  %s111_s27 = scalar_lea.hbm %s224_s1, 512 }
  0x14   :  { %s28_s24 = sshll.u32 %s164_s23, 4  ;;  %p112_p8 = scmp.ne.s32.totalorder %s224_s1, %s111_s27  ;;  %s29_s24 = int_to_ptr.vmem [resolvable:$true] %s28_s24 }
  0x15   :  { %p115_p9 = scmp.lt.u32.totalorder %s111_s27, %s224_s1 }
  0x17   :  { %p117_p10 = pnand %p115_p9, %p112_p8 }
  0x19   :  { %120 = shalt.err (!%p117_p10)
}
  0x1a   :  { %s121_s4 = scalar_lea.vmem %s29_s24, 512  ;;  %p126_p12 = scmp.lt.s32.totalorder %s29_s24, %s29_s24 }
  0x1b   :  { %p122_p11 = scmp.ne.s32.totalorder %s29_s24, %s121_s4  ;;  %p127_p13 = scmp.lt.s32.totalorder %s121_s4, %s121_s4 }
  0x1d   :  { %p128_p0 = por %p127_p13, %p126_p12 }
  0x1f   :  { %p129_p1 = pnand %p128_p0, %p122_p11 }
  0x21   :  { %132 = shalt.err (!%p129_p1)
}
  0x22   :  { %31 = dma.hbm_to_vmem [thread:$0]  %s224_s1, 512, %s29_s24, [#allocation6]  }
  0x23   :  { %155 = dma.done.wait [#allocation3], 1024  }
  0x24   :  { %156 = vsyncadd [#allocation3], 4294966272 }
  0x25   :  { %157 = dma.done.wait [#allocation6], 512  }
  0x26   :  { %158 = vsyncadd [#allocation6], 4294966784  ;;  %v38_v0 = vld [vmem:[#allocation2] sm:$0xff]  ;;  %v39_v2 = vld [vmem:[#allocation2 + $0x8] sm:$0xff]  ;;  %s165_s6 = smov [#allocation7]  }
  0x27   :  { %v46_v1 = vld [vmem:[#allocation5] sm:$0xff]  ;;  %v47_v4 = vld [vmem:[#allocation5 + $0x8] sm:$0xff]  ;;  %v40_v5 = vld [vmem:[#allocation2 + $0x10] sm:$0xff]  ;;  %s71_s7 = sshll.u32 %s165_s6, 4  ;;  %s72_s7 = int_to_ptr.vmem [resolvable:$true] %s71_s7 }
  0x28   :  { %v50_v3 = vadd.f32 %v46_v1, %v38_v0  ;;  %v48_v6 = vld [vmem:[#allocation5 + $0x10] sm:$0xff]  ;;  %v51_v7 = vadd.f32 %v47_v4, %v39_v2  ;;  %v41_v9 = vld [vmem:[#allocation2 + $0x18] sm:$0xff]  ;;  %v42_v11 = vld [vmem:[#allocation2 + $0x20] sm:$0xff]  ;;  %s133_s1 = scalar_lea.vmem %s72_s7, 1024  ;;  %p138_p3 = scmp.lt.s32.totalorder %s72_s7, %s72_s7 }
  0x29   :  { %v52_v8 = vadd.f32 %v48_v6, %v40_v5  ;;  %v49_v10 = vld [vmem:[#allocation5 + $0x18] sm:$0xff]  ;;  %v54_v13 = vadd.f32 %v46_v1, %v42_v11  ;;  %v43_v14 = vld [vmem:[#allocation2 + $0x28] sm:$0xff]  ;;  %v44_v15 = vld [vmem:[#allocation2 + $0x30] sm:$0xff]  ;;  %p134_p2 = scmp.ne.s32.totalorder %s72_s7, %s133_s1  ;;  %p139_p4 = scmp.lt.s32.totalorder %s133_s1, %s133_s1 }
  0x2a   :  { %58 = vst [vmem:[#allocation7] sm:$0xff] %v50_v3  ;;  %v53_v12 = vadd.f32 %v49_v10, %v41_v9  ;;  %v45_v16 = vld [vmem:[#allocation2 + $0x38] sm:$0xff]  ;;  %59 = vst [vmem:[#allocation7 + $0x8] sm:$0xff] %v51_v7  ;;  %v55_v17 = vadd.f32 %v47_v4, %v43_v14  ;;  %v56_v18 = vadd.f32 %v48_v6, %v44_v15 }
  0x2b   :  { %60 = vst [vmem:[#allocation7 + $0x10] sm:$0xff] %v52_v8  ;;  %v57_v19 = vadd.f32 %v49_v10, %v45_v16  ;;  %62 = vst [vmem:[#allocation7 + $0x20] sm:$0xff] %v54_v13  ;;  %p140_p5 = por %p139_p4, %p138_p3 }
  0x2c   :  { %61 = vst [vmem:[#allocation7 + $0x18] sm:$0xff] %v53_v12  ;;  %63 = vst [vmem:[#allocation7 + $0x28] sm:$0xff] %v55_v17 }
  0x2d   :  { %64 = vst [vmem:[#allocation7 + $0x30] sm:$0xff] %v56_v18  ;;  %65 = vst [vmem:[#allocation7 + $0x38] sm:$0xff] %v57_v19  ;;  %p141_p6 = pnand %p140_p5, %p134_p2 }
  0x2f   :  { %144 = shalt.err (!%p141_p6)
}
  0x30   :  { %s145_s10 = scalar_lea.hbm %s225_s2, 1024 }
  0x31   :  { %p146_p7 = scmp.ne.s32.totalorder %s225_s2, %s145_s10  ;;  %p149_p8 = scmp.lt.u32.totalorder %s145_s10, %s225_s2 }
  0x33   :  { %p151_p9 = pnand %p149_p8, %p146_p7 }
  0x35   :  { %154 = shalt.err (!%p151_p9)
}
  0x36   :  { %77 = dma.vmem_to_hbm [thread:$0]  %s72_s7, 1024, %s225_s2, [#allocation4], %s162_s19, %s162_s19, %s163_s20  }
  0x37   :  { %159 = dma.done.wait [#allocation4], 1024  }
  0x38   :  { %160 = vsyncadd [#allocation4], 4294966272 }
  0x39   :  { %81 = vsyncpa [#allocation3], 1 }
  0x3a   :  { %82 = vsyncpa [#allocation6], 1 }
  0x3b   :  { %83 = vsyncpa [#allocation4], 1 }

</bundles_post_ra>
